<compile_context>
chip_gen: v6e
topology: v6e:2x2x1
jax: 0.10.0
libtpu: 0.0.40
codegen_flags: <defaults>
</compile_context>

<pallas_src>
import functools

import numpy as np
import jax
import jax.numpy as jnp
from jax.experimental import pallas as pl
from jax.experimental.pallas import tpu as pltpu

_LANE = 128


def _round_up(x, m):
    return ((x + m - 1) // m) * m


def _fused_mlp_kernel(*refs, n_layers, apply_relu):
    # refs = (x_ref, w0, b0, w1, b1, ..., o_ref)
    x_ref = refs[0]
    o_ref = refs[1 + 2 * n_layers]
    h = x_ref[...]                                    # (tb, d_in) -- no extra cast
    for l in range(n_layers):                         # static unroll over layers
        w_ref = refs[1 + 2 * l]                       # (din_l, dout_l_pad)
        b_ref = refs[2 + 2 * l]                       # (1, dout_l_pad) f32
        # MXU matmul (bf16 operands by default), f32 accumulation.
        y = jnp.dot(h.astype(w_ref.dtype), w_ref[...],
                    preferred_element_type=jnp.float32)
        y = y + b_ref[...]                            # bias broadcast (f32, VPU)
        h = jnp.maximum(y, 0.0) if apply_relu else y  # f32 epilogue (v5e fast path)
    o_ref[...] = h.astype(o_ref.dtype)


def init_great_meta_mlp_params(layers, key):
    """init_method='norm': weight ~ N(0, 0.01), bias = 0 (PyTorch (out, in) layout)."""
    params = []
    for d_in, d_out in zip(layers[:-1], layers[1:]):
        key, sub = jax.random.split(key)
        w = 0.01 * jax.random.normal(sub, (d_out, d_in), dtype=jnp.float32)
        b = jnp.zeros((d_out,), dtype=jnp.float32)
        params.append((w, b))
    return params


def pack_params(params, mxu_dtype=jnp.bfloat16):
    """Transpose to (d_in, d_out); zero-pad output dims (and input dims of layers
    >= 1) to multiples of 128 lanes; cast weights to `mxu_dtype`. Layer 0's input
    dim stays unpadded so x needs no wrapper-side pad. Biases stay f32 (epilogue)."""
    packed = []
    for l, (w, b) in enumerate(params):
        d_out, d_in = w.shape
        dip = d_in if l == 0 else _round_up(d_in, _LANE)
        dop = _round_up(d_out, _LANE)
        wt = jnp.zeros((dip, dop), jnp.float32).at[:d_in, :d_out].set(w.T)
        bp = jnp.zeros((1, dop), jnp.float32).at[0, :d_out].set(b)
        packed.append((wt.astype(mxu_dtype), bp))
    return packed


def great_meta_mlp_forward(x, packed_params, layers, *, block_batch=512,
                           min_grid_steps=2, activation="relu",
                           out_dtype=jnp.float32, slice_output=True):
    """Fused GreatMetaMLPLayers forward (dropout=0.0, bn=False).

    x:              (B, layers[0]) float32 (or bf16 -- saves layer-0 input DMA)
    packed_params:  output of pack_params(...)
    layers:         the module's layer-width list, e.g. [32, 64, 32, 16]
    min_grid_steps: keep the parallel grid >= this many steps (2 keeps both v7x
                    TensorCores busy; 1 is fine for tiny B on v5e/v6e)
    out_dtype:      jnp.bfloat16 halves HBM writeback on v6e/v7x
    slice_output:   False returns the 128-lane padded block (slice lazily downstream)
    """
    B, d_in = x.shape
    n_layers = len(packed_params)
    assert n_layers == len(layers) - 1 and d_in == layers[0]
    d_out = layers[-1]
    d_out_pad = packed_params[-1][0].shape[1]

    # Batch tile: multiple of 16 sublanes (bf16 activations), capped so the
    # "parallel" grid axis has at least `min_grid_steps` steps. Any ragged last
    # tile is handled by Pallas -- no wrapper-side padding of x.
    tb_cap = _round_up(pl.cdiv(B, max(int(min_grid_steps), 1)), 16)
    tb = min(_round_up(block_batch, 16), tb_cap)
    if tb >= B:
        tb = B                      # single full-batch tile (block == array dim)
    grid_b = pl.cdiv(B, tb)

    in_specs = [pl.BlockSpec((tb, d_in), lambda i: (i, 0))]
    flat_params = []
    for (w, b) in packed_params:
        dip, dop = w.shape
        # Constant index_map -> weights/biases DMA'd once, resident across tiles.
        in_specs.append(pl.BlockSpec((dip, dop), lambda i: (0, 0)))
        in_specs.append(pl.BlockSpec((1, dop), lambda i: (0, 0)))
        flat_params += [w, b]

    # CostEstimate with true (unpadded) dims / true input bytes.
    flops = sum(2 * B * di * do for di, do in zip(layers[:-1], layers[1:]))
    bytes_accessed = x.size * x.dtype.itemsize
    bytes_accessed += sum(w.size * w.dtype.itemsize + b.size * b.dtype.itemsize
                          for (w, b) in packed_params)
    bytes_accessed += B * d_out_pad * np.dtype(out_dtype).itemsize

    kernel = functools.partial(_fused_mlp_kernel, n_layers=n_layers,
                               apply_relu=(activation == "relu"))

    out = pl.pallas_call(
        kernel,
        out_shape=jax.ShapeDtypeStruct((B, d_out_pad), out_dtype),
        grid_spec=pl.GridSpec(
            grid=(grid_b,),
            in_specs=in_specs,
            out_specs=pl.BlockSpec((tb, d_out_pad), lambda i: (i, 0)),
        ),
        compiler_params=pltpu.CompilerParams(
            dimension_semantics=("parallel",)),
        cost_estimate=pl.CostEstimate(
            flops=flops, transcendentals=0, bytes_accessed=bytes_accessed),
    )(x, *flat_params)

    return out[:, :d_out] if slice_output else out


if __name__ == "__main__":
    # GreatMetaMLPLayers(layers=[32, 64, 32, 16], dropout=0.0, activation='relu',
    #                    bn=False, init_method='norm')
    layers = [32, 64, 32, 16]
    batch = 64   # with min_grid_steps=2 -> two 32-row batch tiles on the parallel axis

    key = jax.random.PRNGKey(0)
    key, xkey = jax.random.split(key)
    x = jax.random.normal(xkey, (batch, layers[0]), dtype=jnp.float32)

    params = init_great_meta_mlp_params(layers, key)
    packed = pack_params(params)

    out = great_meta_mlp_forward(x, packed, layers)
    out = jax.block_until_ready(out)
    assert out.shape == (batch, layers[-1]) and out.dtype == jnp.float32

    # Reference 1: identical numerics (bf16 MXU operands, f32 accumulation).
    ref = x
    for (w, b) in params:
        ref = jnp.dot(ref.astype(jnp.bfloat16), w.T.astype(jnp.bfloat16),
                      preferred_element_type=jnp.float32) + b[None, :]
        ref = jnp.maximum(ref, 0.0)
    assert jnp.allclose(out, ref, atol=1e-5, rtol=1e-2), float(
        jnp.max(jnp.abs(out - ref)))

    # Reference 2: pure-f32 torch-module parity (loose tol due to bf16 MXU operands).
    ref32 = x
    for (w, b) in params:
        ref32 = jnp.maximum(ref32 @ w.T + b[None, :], 0.0)
    assert jnp.allclose(out, ref32, atol=1e-4, rtol=5e-2), float(
        jnp.max(jnp.abs(out - ref32)))

    print("KERNEL_OK")
</pallas_src>

<mosaic_0001>
module attributes {stable_mosaic.version = 11 : i64} {
  func.func @_fused_mlp_kernel(%arg0: i32, %arg1: memref<32x32xf32, #tpu.memory_space<vmem>>, %arg2: memref<32x128xbf16, #tpu.memory_space<vmem>>, %arg3: memref<1x128xf32, #tpu.memory_space<vmem>>, %arg4: memref<128x128xbf16, #tpu.memory_space<vmem>>, %arg5: memref<1x128xf32, #tpu.memory_space<vmem>>, %arg6: memref<128x128xbf16, #tpu.memory_space<vmem>>, %arg7: memref<1x128xf32, #tpu.memory_space<vmem>>, %arg8: memref<32x128xf32, #tpu.memory_space<vmem>>) attributes {dimension_semantics = [#tpu.dimension_semantics<parallel>], iteration_bounds = array<i64: 2>, scalar_prefetch = 0 : i64, scratch_operands = 0 : i64, tpu.core_type = #tpu.core_type<tc>, window_params = [{transform_indices = @transform_0, window_bounds = array<i64: 32, 32>}, {pipeline_mode = #tpu.pipeline_mode<synchronous>, transform_indices = @transform_1, window_bounds = array<i64: 32, 128>}, {pipeline_mode = #tpu.pipeline_mode<synchronous>, transform_indices = @transform_2, window_bounds = array<i64: 1, 128>}, {pipeline_mode = #tpu.pipeline_mode<synchronous>, transform_indices = @transform_3, window_bounds = array<i64: 128, 128>}, {pipeline_mode = #tpu.pipeline_mode<synchronous>, transform_indices = @transform_4, window_bounds = array<i64: 1, 128>}, {pipeline_mode = #tpu.pipeline_mode<synchronous>, transform_indices = @transform_5, window_bounds = array<i64: 128, 128>}, {pipeline_mode = #tpu.pipeline_mode<synchronous>, transform_indices = @transform_6, window_bounds = array<i64: 1, 128>}, {transform_indices = @transform_7, window_bounds = array<i64: 32, 128>}]} {
    %c0 = arith.constant 0 : index
    %c0_0 = arith.constant 0 : index
    %0 = vector.load %arg1[%c0, %c0_0] : memref<32x32xf32, #tpu.memory_space<vmem>>, vector<32x32xf32>
    %1 = arith.truncf %0 : vector<32x32xf32> to vector<32x32xbf16>
    %c0_1 = arith.constant 0 : index
    %c0_2 = arith.constant 0 : index
    %2 = vector.load %arg2[%c0_1, %c0_2] : memref<32x128xbf16, #tpu.memory_space<vmem>>, vector<32x128xbf16>
    %cst = arith.constant dense<0.000000e+00> : vector<32x128xf32>
    %3 = tpu.matmul %1, %2, %cst {dimension_numbers = #tpu.dot_dimension_numbers<[1], [0], [0], [1], [0, 0, 1, 1], [], []>} : vector<32x32xbf16>, vector<32x128xbf16>, vector<32x128xf32> -> vector<32x128xf32>
    %c0_3 = arith.constant 0 : index
    %c0_4 = arith.constant 0 : index
    %4 = vector.load %arg3[%c0_3, %c0_4] : memref<1x128xf32, #tpu.memory_space<vmem>>, vector<1x128xf32>
    %5 = vector.broadcast %4 : vector<1x128xf32> to vector<32x128xf32>
    %6 = arith.addf %3, %5 : vector<32x128xf32>
    %cst_5 = arith.constant 0.000000e+00 : f32
    %7 = vector.broadcast %cst_5 : f32 to vector<32x128xf32>
    %8 = arith.maximumf %6, %7 : vector<32x128xf32>
    %9 = arith.truncf %8 : vector<32x128xf32> to vector<32x128xbf16>
    %c0_6 = arith.constant 0 : index
    %c0_7 = arith.constant 0 : index
    %10 = vector.load %arg4[%c0_6, %c0_7] : memref<128x128xbf16, #tpu.memory_space<vmem>>, vector<128x128xbf16>
    %cst_8 = arith.constant dense<0.000000e+00> : vector<32x128xf32>
    %11 = tpu.matmul %9, %10, %cst_8 {dimension_numbers = #tpu.dot_dimension_numbers<[1], [0], [0], [1], [0, 0, 1, 1], [], []>} : vector<32x128xbf16>, vector<128x128xbf16>, vector<32x128xf32> -> vector<32x128xf32>
    %c0_9 = arith.constant 0 : index
    %c0_10 = arith.constant 0 : index
    %12 = vector.load %arg5[%c0_9, %c0_10] : memref<1x128xf32, #tpu.memory_space<vmem>>, vector<1x128xf32>
    %13 = vector.broadcast %12 : vector<1x128xf32> to vector<32x128xf32>
    %14 = arith.addf %11, %13 : vector<32x128xf32>
    %cst_11 = arith.constant 0.000000e+00 : f32
    %15 = vector.broadcast %cst_11 : f32 to vector<32x128xf32>
    %16 = arith.maximumf %14, %15 : vector<32x128xf32>
    %17 = arith.truncf %16 : vector<32x128xf32> to vector<32x128xbf16>
    %c0_12 = arith.constant 0 : index
    %c0_13 = arith.constant 0 : index
    %18 = vector.load %arg6[%c0_12, %c0_13] : memref<128x128xbf16, #tpu.memory_space<vmem>>, vector<128x128xbf16>
    %cst_14 = arith.constant dense<0.000000e+00> : vector<32x128xf32>
    %19 = tpu.matmul %17, %18, %cst_14 {dimension_numbers = #tpu.dot_dimension_numbers<[1], [0], [0], [1], [0, 0, 1, 1], [], []>} : vector<32x128xbf16>, vector<128x128xbf16>, vector<32x128xf32> -> vector<32x128xf32>
    %c0_15 = arith.constant 0 : index
    %c0_16 = arith.constant 0 : index
    %20 = vector.load %arg7[%c0_15, %c0_16] : memref<1x128xf32, #tpu.memory_space<vmem>>, vector<1x128xf32>
    %21 = vector.broadcast %20 : vector<1x128xf32> to vector<32x128xf32>
    %22 = arith.addf %19, %21 : vector<32x128xf32>
    %cst_17 = arith.constant 0.000000e+00 : f32
    %23 = vector.broadcast %cst_17 : f32 to vector<32x128xf32>
    %24 = arith.maximumf %22, %23 : vector<32x128xf32>
    %c0_18 = arith.constant 0 : index
    %c0_19 = arith.constant 0 : index
    %25 = vector.load %arg8[%c0_18, %c0_19] : memref<32x128xf32, #tpu.memory_space<vmem>>, vector<32x128xf32>
    tpu.vector_store %arg8[%c0_18, %c0_19], %24 {strides = array<i32>} : memref<32x128xf32, #tpu.memory_space<vmem>>, vector<32x128xf32>,
    return
  }
  func.func @transform_0(%arg0: i32) -> (i32, i32) {
    %c0_i32 = arith.constant 0 : i32
    %c0_i32_0 = arith.constant 0 : i32
    return %arg0, %c0_i32 : i32, i32
  }
  func.func @transform_1(%arg0: i32) -> (i32, i32) {
    %c0_i32 = arith.constant 0 : i32
    %c0_i32_0 = arith.constant 0 : i32
    %c0_i32_1 = arith.constant 0 : i32
    return %c0_i32, %c0_i32_0 : i32, i32
  }
  func.func @transform_2(%arg0: i32) -> (i32, i32) {
    %c0_i32 = arith.constant 0 : i32
    %c0_i32_0 = arith.constant 0 : i32
    %c0_i32_1 = arith.constant 0 : i32
    return %c0_i32, %c0_i32_0 : i32, i32
  }
  func.func @transform_3(%arg0: i32) -> (i32, i32) {
    %c0_i32 = arith.constant 0 : i32
    %c0_i32_0 = arith.constant 0 : i32
    %c0_i32_1 = arith.constant 0 : i32
    return %c0_i32, %c0_i32_0 : i32, i32
  }
  func.func @transform_4(%arg0: i32) -> (i32, i32) {
    %c0_i32 = arith.constant 0 : i32
    %c0_i32_0 = arith.constant 0 : i32
    %c0_i32_1 = arith.constant 0 : i32
    return %c0_i32, %c0_i32_0 : i32, i32
  }
  func.func @transform_5(%arg0: i32) -> (i32, i32) {
    %c0_i32 = arith.constant 0 : i32
    %c0_i32_0 = arith.constant 0 : i32
    %c0_i32_1 = arith.constant 0 : i32
    return %c0_i32, %c0_i32_0 : i32, i32
  }
  func.func @transform_6(%arg0: i32) -> (i32, i32) {
    %c0_i32 = arith.constant 0 : i32
    %c0_i32_0 = arith.constant 0 : i32
    %c0_i32_1 = arith.constant 0 : i32
    return %c0_i32, %c0_i32_0 : i32, i32
  }
  func.func @transform_7(%arg0: i32) -> (i32, i32) {
    %c0_i32 = arith.constant 0 : i32
    %c0_i32_0 = arith.constant 0 : i32
    return %arg0, %c0_i32 : i32, i32
  }
}

</mosaic_0001>

<bundles_post_ra>
// kernel: tpu_custom_call.1
= control target key start
LH: loop header
LB: loop body
LE: loop exit
PB: predicated region body
PF: predicated region fallthrough
CT: control target
= control target key end

     0   :  { %12 = vsyncpa [#allocation3], 0  ;;  %s1207_s0 = inlined_call_operand.vmem [shape: f32[64,32], index: 0, kind: input, shape index: {}]   ;;  %s1208_s1 = inlined_call_operand.vmem [shape: bf16[32,128], index: 1, kind: input, shape index: {}]   ;;  %s1209_s2 = inlined_call_operand.vmem [shape: f32[1,128], index: 2, kind: input, shape index: {}]   ;;  %s1210_s3 = inlined_call_operand.vmem [shape: bf16[128,128], index: 3, kind: input, shape index: {}]   ;;  %s1211_s4 = inlined_call_operand.vmem [shape: f32[1,128], index: 4, kind: input, shape index: {}]   ;;  %s1212_s5 = inlined_call_operand.hbm [shape: bf16[128,128], index: 5, kind: input, shape index: {}]   ;;  %s1213_s6 = inlined_call_operand.vmem [shape: f32[1,128], index: 6, kind: input, shape index: {}]   ;;  %s1214_s7 = inlined_call_operand.hbm [shape: f32[64,128], index: 7, kind: output, shape index: {}]  }
   0x1   :  { %13 = vsyncpa [#allocation4], 0 }
   0x2   :  { %15 = vsyncpa [#allocation4 + $0x1], 0  ;;  %s1049_s24 = smov 0   ;;  %s1051_s25 = smov 0  }
   0x3   :  { %s1053_s26 = smov 0   ;;  %s1055_s27 = smov 0  }
   0x4 LB: > { %s1070_s28 = sadd.s32 4294967295, %s1001_s27   ;;  %s729_s29 = sadd.s32 4294967294, %s1001_s27   ;;  %s1001_s27 = sphi %s1055_s27, %s1222_s27   ;;  %s997_s26 = sphi %s1053_s26, %s1221_s26   ;;  %s993_s25 = sphi %s1051_s25, %s1220_s25   ;;  %s989_s24 = sphi %s1049_s24, %s1219_s24  }
   0x5   : > { %s1074_s30 = sadd.s32 1, %s1001_s27   ;;  %s180_s8 = sadd.s32 1, %s997_s26 }
   0x6   : > { %s177_s9 = ssub.s32 %s1001_s27, %s1074_s30  ;;  %p190_p0 = scmp.ne.s32.totalorder %s997_s26, %s993_s25 }
   0x7   : > { %p178_p1 = scmp.eq.s32.totalorder %s177_s9, 0  ;;  %p191_p2 = scmp.eq.s32.totalorder %s1070_s28, 1 }
   0x8   : > { %p196_p3 = scmp.ne.s32.totalorder %s993_s25, %s989_s24  ;;  %p197_p4 = scmp.eq.s32.totalorder %s729_s29, 1 }
   0x9   : > { %s1085_s10 = scalar_select %p178_p1, %s997_s26, %s180_s8  }
   0xa   : > { %p1087_p5 = por %p191_p2, %p190_p0  ;;  %p1091_p6 = por %p197_p4, %p196_p3 }
   0xb   : > { %p730_p7 = scmp.ge.s32.totalorder %s1001_s27, 1  ;;  %p204_p8 = scmp.lt.s32.totalorder %s1001_s27, 3 }
   0xc   : > { %s1216_s12 = scalar_select %p1091_p6, 1, 0 }
   0xd   : > { %p853_p9 = scmp.eq.s32.totalorder %s1070_s28, 0  ;;  %p1098_p10 = pnand %p730_p7, %p204_p8 }
   0xe   : > { %s1003_s14 = smov [#allocation2]  }
   0xf   : > { %s228_s15 = sshll.u32 %s1003_s14, 4  ;;  %p845_p11 = pneg %p1098_p10  ;;  %s229_s15 = int_to_ptr.vmem [resolvable:$true] %s228_s15 }
  0x10   : > { %s922_s16 = scalar_lea.vmem %s229_s15, 1024  ;;  %p930_p3 = scmp.lt.s32.totalorder %s229_s15, %s229_s15 }
  0x11   : > { %p846_p12 = pnand %p853_p9, %p845_p11  ;;  %p923_p0 = scmp.ne.s32.totalorder %s229_s15, %s922_s16 }
  0x12   : > { %p931_p4 = scmp.lt.s32.totalorder %s922_s16, %s922_s16 }
  0x13   : > { %p913_p13 = pneg %p846_p12 }
  0x14   : > { %p932_p6 = por %p931_p4, %p930_p3 }
  0x15   : > { %p925_p1 = pnand %p923_p0, %p913_p13 }
  0x17   : > { %p926_p2 = pneg %p925_p1 }
  0x19   : > { %p933_p7 = pnand %p932_p6, %p926_p2 }
  0x1b   : > { %936 = shalt.err (!%p933_p7)
}
  0x1c   : > { %s1004_s17 = smov 64   ;;  %s1005_s18 = smov 4  }
  0x1d   : > { %848 = dma.hbm_to_vmem [thread:$0]  (!%p846_p12), %s1212_s5, 1024, %s229_s15, [#allocation3], %s1004_s17, %s1004_s17, %s1005_s18  }
  0x1e   : > { %256 = sbr.rel (%p1098_p10) target bundleno = 675 (0x2a3), region = 48 }
  0x23   : > { %980 = dma.done.wait (%p853_p9), [#allocation3], 1024  }
  0x24   : > { %982 = vsyncadd (%p853_p9), [#allocation3], 4294966272  ;;  %s736_s21 = sshll.u32 %s1070_s28, 2  ;;  %v893_v0 = vld [vmem:[%s1208_s1 + $0x8] sm:$0xff]   ;;  %v894_v1 = vld [vmem:[%s1208_s1] sm:$0xff]   ;;  %vm325_vm0 = vcmask 261120  }
  0x25   : > { %p289_p8 = scmp.lt.s32.totalorder %s736_s21, 7  ;;  %791 = vmatprep.subr.bf16.mxu0 %v893_v0  ;;  %v895_v7 = vld [vmem:[%s1210_s3 + $0x38] sm:$0xff]   ;;  %v896_v8 = vld [vmem:[%s1210_s3 + $0x30] sm:$0xff]   ;;  %v897_v10 = vld [vmem:[%s1210_s3 + $0x28] sm:$0xff]   ;;  %s766_s13 = sshll.u32 %s1070_s28, 9 }
  0x26   : > { %792 = vmatpush3.bf16.msra.mxu0 %v893_v0  ;;  %799 = vmatprep.subr.bf16.mxu1 %v895_v7  ;;  %v898_v11 = vld [vmem:[%s1210_s3 + $0x20] sm:$0xff]   ;;  %v899_v12 = vld [vmem:[%s1210_s3 + $0x18] sm:$0xff]   ;;  %v900_v13 = vld [vmem:[%s1210_s3 + $0x10] sm:$0xff]   ;;  %s1165_s17 = scalar_lea.hbm %s1214_s7, %s766_s13  ;;  %s1006_s19 = smov [#allocation5]  }
  0x27   : > { %s1224_s21 = smov (!%p289_p8, %s736_s21), 7  ;;  %793 = vmatprep.subr.bf16.mxu0 %v894_v1  ;;  %800 = vmatpush3.bf16.msra.mxu1 %v895_v7  ;;  %v901_v14 = vld [vmem:[%s1210_s3 + $0x8] sm:$0xff]   ;;  %v902_v15 = vld [vmem:[%s1210_s3] sm:$0xff]   ;;  %v903_v16 = vld [vmem:[#allocation2 + $0x38] sm:$0xff]   ;;  %s941_s20 = sshll.u32 %s1006_s19, 4  ;;  %s942_s20 = int_to_ptr.vmem [resolvable:$false] %s941_s20 }
  0x28   : > { %s737_s22 = sshll.u32 %s1224_s21, 3  ;;  %801 = vmatprep.subr.bf16.mxu1 %v896_v8  ;;  %v904_v17 = vld [vmem:[#allocation2 + $0x30] sm:$0xff]   ;;  %v905_v18 = vld [vmem:[#allocation2 + $0x28] sm:$0xff]   ;;  %v906_v19 = vld [vmem:[#allocation2 + $0x20] sm:$0xff]   ;;  %s943_s21 = scalar_lea.vmem %s942_s20, 1024 }
  0x29   : > { %s292_s8 = scalar_lea.vmem %s1207_s0, %s737_s22  ;;  %v907_v20 = vld [vmem:[#allocation2 + $0x18] sm:$0xff]   ;;  %v738_v23 = vld [vmem:[%s1209_s2] ss:$0 sm:$0xff]  ;;  %v908_v36 = vld [vmem:[#allocation2 + $0x10] sm:$0xff]   ;;  %s285_s22 = sand.u32 1, %s993_s25  }
  0x2a   : > { %v296_v2 = vld [vmem:[%s292_s8] sm:$0xff]  ;;  %v297_v3 = vld [vmem:[%s292_s8 + $0x8] sm:$0xff]  ;;  %v298_v4 = vld [vmem:[%s292_s8 + $0x10] sm:$0xff]  ;;  %794 = vmatpush3.bf16.msra.mxu0 %v894_v1  ;;  %s1167_s18 = scalar_lea.sflag [#allocation4], %s285_s22 }
  0x2b   : > { %v300_v5 = vpack.c.bf16 %v297_v3, %v296_v2  ;;  %v299_v6 = vld [vmem:[%s292_s8 + $0x18] sm:$0xff]  ;;  %802 = vmatpush3.bf16.msra.mxu1 %v896_v8  ;;  %819 = vmatprep.subr.bf16.mxu0 %v903_v16  ;;  %v909_v37 = vld [vmem:[#allocation2 + $0x8] sm:$0xff]   ;;  %v910_v38 = vld [vmem:[#allocation2] sm:$0xff]   ;;  %s735_s8 = sshll.u32 %s285_s22, 5 }
  0x2c   : > { %v301_v9 = vpack.c.bf16 %v299_v6, %v298_v4  ;;  %803 = vmatprep.subr.bf16.mxu1 %v897_v10  ;;  %v743_v41 = vld [vmem:[%s1211_s4] ss:$0 sm:$0xff]  ;;  %s287_s9 = scalar_lea.vmem [#allocation5], %s735_s8 }
  0x2d   : > { %795 = vmatprep.mubr.msk.bf16.mxu0 %vm325_vm0, %v300_v5  ;;  %v752_v54 = vld [vmem:[%s1213_s6] ss:$0 sm:$0xff]  ;;  %s655_s14 = sshll.u32 %s287_s9, 4  ;;  %s1160_s14 = int_to_ptr.vmem [resolvable:$true] %s655_s14 }
  0x2e   : > { %796 = vmatmul.mubr.msk.bf16.vlgmr.msra.gmra.mxu0 %vm325_vm0, %v301_v9  ;;  %s937_s28 = scalar_lea.vmem %s1160_s14, 512  ;;  %p944_p11 = scmp.lt.s32.totalorder %s1160_s14, %s942_s20 }
  0x2f   : > { %804 = vmatpush3.bf16.msra.mxu1 %v897_v10  ;;  %820 = vmatpush3.bf16.msra.mxu0 %v903_v16  ;;  %p938_p6 = scmp.ne.s32.totalorder %s1160_s14, %s937_s28  ;;  %p945_p12 = scmp.lt.s32.totalorder %s943_s21, %s937_s28 }
  0x30   : > { %805 = vmatprep.subr.bf16.mxu1 %v898_v11  ;;  %821 = vmatprep.subr.bf16.mxu0 %v904_v17 }
  0x31   : > { %p939_p9 = pnand %p938_p6, %p1087_p5  ;;  %p946_p13 = por %p945_p12, %p944_p11 }
  0x33   : > { %806 = vmatpush3.bf16.msra.mxu1 %v898_v11  ;;  %822 = vmatpush3.bf16.msra.mxu0 %v904_v17  ;;  %p940_p10 = pneg %p939_p9 }
  0x34   : > { %807 = vmatprep.subr.bf16.mxu1 %v899_v12  ;;  %823 = vmatprep.subr.bf16.mxu0 %v905_v18 }
  0x35   : > { %p947_p0 = pnand %p946_p13, %p940_p10 }
  0x37   : > { %808 = vmatpush3.bf16.msra.mxu1 %v899_v12  ;;  %824 = vmatpush3.bf16.msra.mxu0 %v905_v18 }
  0x38   : > { %809 = vmatprep.subr.bf16.mxu1 %v900_v13  ;;  %825 = vmatprep.subr.bf16.mxu0 %v906_v19 }
  0x3b   : > { %810 = vmatpush3.bf16.msra.mxu1 %v900_v13  ;;  %826 = vmatpush3.bf16.msra.mxu0 %v906_v19 }
  0x3c   : > { %811 = vmatprep.subr.bf16.mxu1 %v901_v14  ;;  %827 = vmatprep.subr.bf16.mxu0 %v907_v20 }
  0x3f   : > { %812 = vmatpush3.bf16.msra.mxu1 %v901_v14  ;;  %828 = vmatpush3.bf16.msra.mxu0 %v907_v20 }
  0x40   : > { %813 = vmatprep.subr.bf16.mxu1 %v902_v15  ;;  %829 = vmatprep.subr.bf16.mxu0 %v908_v36 }
  0x43   : > { %814 = vmatpush3.bf16.msra.mxu1 %v902_v15  ;;  %830 = vmatpush3.bf16.msra.mxu0 %v908_v36 }
  0x44   : > { %831 = vmatprep.subr.bf16.mxu0 %v909_v37 }
  0x47   : > { %832 = vmatpush3.bf16.msra.mxu0 %v909_v37 }
  0x48   : > { %833 = vmatprep.subr.bf16.mxu0 %v910_v38 }
  0x4b   : > { %834 = vmatpush3.bf16.msra.mxu0 %v910_v38 }
  0xee   : > { %v797_v21 = vpop.f32.mrf.mxu0 }
  0xef   : > { %v375_v27 = vadd.f32 %v797_v21, %v738_v23 }
  0xf0   : > { %v366_v22 = vpop.f32.mrf.mxu0 }
  0xf1   : > { %v367_v25 = vadd.f32 %v738_v23, %v366_v22  ;;  %v383_v33 = vmax.f32 %v375_v27, 0.0 }
  0xf2   : > { %v798_v24 = vpop.f32.mrf.mxu0 }
  0xf3   : > { %v378_v26 = vadd.f32 %v798_v24, %v738_v23  ;;  %v381_v31 = vmax.f32 %v367_v25, 0.0 }
  0xf4   : > { %v369_v28 = vpop.f32.mrf.mxu0 }
  0xf5   : > { %v370_v29 = vadd.f32 %v738_v23, %v369_v28  ;;  %v384_v30 = vmax.f32 %v378_v26, 0.0 }
  0xf7   : > { %v382_v32 = vmax.f32 %v370_v29, 0.0  ;;  %v386_v35 = vpack.c.bf16 %v384_v30, %v383_v33 }
  0xf9   : > { %v385_v34 = vpack.c.bf16 %v382_v32, %v381_v31 }
  0xfb   : > { %815 = vmatprep.mubr.bf16.mxu1 %v385_v34 }
  0xfc   : > { %816 = vmatmul.mubr.bf16.vlgmr.msra.gmra.mxu1 %v386_v35 }
 0x1bc   : > { %v817_v39 = vpop.f32.mrf.mxu1 }
 0x1bd   : > { %v501_v45 = vadd.f32 %v817_v39, %v743_v41 }
 0x1be   : > { %v492_v40 = vpop.f32.mrf.mxu1 }
 0x1bf   : > { %v493_v43 = vadd.f32 %v743_v41, %v492_v40  ;;  %v509_v51 = vmax.f32 %v501_v45, 0.0 }
 0x1c0   : > { %v818_v42 = vpop.f32.mrf.mxu1 }
 0x1c1   : > { %v504_v44 = vadd.f32 %v818_v42, %v743_v41  ;;  %v507_v49 = vmax.f32 %v493_v43, 0.0 }
 0x1c2   : > { %v495_v46 = vpop.f32.mrf.mxu1 }
 0x1c3   : > { %v496_v47 = vadd.f32 %v743_v41, %v495_v46  ;;  %v510_v48 = vmax.f32 %v504_v44, 0.0 }
 0x1c5   : > { %v508_v50 = vmax.f32 %v496_v47, 0.0  ;;  %v512_v53 = vpack.c.bf16 %v510_v48, %v509_v51 }
 0x1c7   : > { %v511_v52 = vpack.c.bf16 %v508_v50, %v507_v49 }
 0x1c9   : > { %835 = vmatprep.mubr.bf16.mxu0 %v511_v52 }
 0x1ca   : > { %836 = vmatmul.mubr.bf16.vlgmr.msra.gmra.mxu0 %v512_v53 }
 0x28a   : > { %v837_v55 = vpop.f32.mrf.mxu0 }
 0x28b   : > { %v627_v56 = vadd.f32 %v837_v55, %v752_v54 }
 0x28c   : > { %v618_v57 = vpop.f32.mrf.mxu0 }
 0x28d   : > { %v635_v58 = vmax.f32 %v627_v56, 0.0  ;;  %v619_v59 = vadd.f32 %v752_v54, %v618_v57 }
 0x28e   : > { %v838_v60 = vpop.f32.mrf.mxu0 }
 0x28f   : > { %639 = vst [vmem:[%s287_s9 + $0x10] sm:$0xff] %v635_v58  ;;  %v633_v61 = vmax.f32 %v619_v59, 0.0  ;;  %v630_v62 = vadd.f32 %v838_v60, %v752_v54 }
 0x290   : > { %v621_v63 = vpop.f32.mrf.mxu0 }
 0x291   : > { %637 = vst [vmem:[%s287_s9] sm:$0xff] %v633_v61  ;;  %v636_v0 = vmax.f32 %v630_v62, 0.0  ;;  %v622_v1 = vadd.f32 %v752_v54, %v621_v63 }
 0x293   : > { %640 = vst [vmem:[%s287_s9 + $0x18] sm:$0xff] %v636_v0  ;;  %v634_v2 = vmax.f32 %v622_v1, 0.0 }
 0x295   : > { %638 = vst [vmem:[%s287_s9 + $0x8] sm:$0xff] %v634_v2 }
 0x296   : > { %950 = shalt.err (!%p947_p0)
}
 0x297   : > { %s951_s22 = scalar_lea.hbm %s1165_s17, 512  ;;  %s955_s8 = scalar_lea.hbm %s1214_s7, 1024 }
 0x298   : > { %p952_p1 = scmp.ne.s32.totalorder %s1165_s17, %s951_s22  ;;  %p956_p4 = scmp.lt.s32.totalorder %s1165_s17, %s1214_s7 }
 0x299   : > { %p957_p7 = scmp.lt.s32.totalorder %s955_s8, %s951_s22 }
 0x29a   : > { %p953_p2 = pnand %p952_p1, %p1087_p5 }
 0x29b   : > { %p958_p8 = por %p957_p7, %p956_p4 }
 0x29c   : > { %p954_p3 = pneg %p953_p2 }
 0x29e   : > { %p959_p6 = pnand %p958_p8, %p954_p3 }
 0x2a0   : > { %962 = shalt.err (!%p959_p6)
}
 0x2a1   : > { %s1007_s15 = smov 128   ;;  %s1008_s16 = smov 8  }
 0x2a2   : > { %843 = dma.vmem_to_hbm [thread:$0]  (%p1087_p5), %s1160_s14, 512, %s1165_s17, %s1167_s18, %s1007_s15, %s1007_s15, %s1008_s16  }
 0x2a3 PF: > { %p855_p9 = scmp.ge.s32.totalorder %s1001_s27, 2  ;;  %s670_s28 = sand.u32 1, %s989_s24  }
 0x2a4   : > { %p1218_p10 = scmp.ne.s32.totalorder %s1216_s12, 0  ;;  %s671_s19 = scalar_lea.sflag [#allocation4], %s670_s28 }
 0x2a6   : > { %p850_p11 = pnand %p855_p9, %p1218_p10 }
 0x2a8   : > { %p851_p12 = pneg %p850_p11 }
 0x2aa   : > { %984 = dma.done.wait (%p851_p12), %s671_s19, 512  }
 0x2ab   : > { %986 = vsyncadd (%p851_p12), %s671_s19, 4294966784  ;;  %p18_p13 = scmp.ge.s32.totalorder %s1074_s30, 4   ;;  %s1219_s24 = smov %s993_s25 }
 0x2ac   : > { %s1220_s25 = smov %s997_s26  ;;  %s1221_s26 = smov %s1085_s10 }
 0x2ad   : > { %s1222_s27 = smov %s1074_s30  ;;  %20 = sbr.rel (!%p18_p13) target bundleno = 4 (0x4), region = 88 }
 0x2b2   :  { %676 = vsyncpa [#allocation3], 1 }
 0x2b3   :  { %678 = vsyncpa [#allocation3 + $0x1], 1 }
 0x2b4   :  { %679 = vsyncpa [#allocation4], 1 }
 0x2b5   :  { %681 = vsyncpa [#allocation4 + $0x1], 1 }

</bundles_post_ra>
